<compile_context>
chip_gen: v5e
topology: v5e:2x2
jax: 0.10.0
libtpu: 0.0.40
codegen_flags: <defaults>
</compile_context>

<pallas_src>
import functools

import jax
import jax.numpy as jnp
from jax.experimental import pallas as pl
from jax.experimental.pallas import tpu as pltpu

LANE = 128                       # lane width (last dim of every block)
TARGET_BLOCK_BYTES = 4 << 20     # ~4 MiB of native-dtype bytes per grid step


def _saturated_kernel(x_ref, acc_ref):
    """Accumulate per-lane partial sums of max(x,1) - min(x,0)."""
    @pl.when(pl.program_id(1) == 0)
    def _():
        acc_ref[...] = jnp.zeros_like(acc_ref)

    # Single sweep over the block: cast, clamp both ways, fused sum.
    # TODO(synk): if a bundle dump shows the f32 cast materializing a full-block
    # VMEM temp for sub-32-bit inputs, restructure as a fori_loop over sublane
    # chunks; with the fused single reduction the extra VMEM traffic stays well
    # below the HBM roofline, so the simple one-pass body is kept.
    x = x_ref[...].astype(jnp.float32)            # (TR, LANE)
    xr = x.reshape(-1, 8, x.shape[-1])            # (TR//8, 8, LANE) VPU-only fold
    acc_ref[...] += jnp.sum(jnp.maximum(xr, 1.0) - jnp.minimum(xr, 0.0), axis=0)


def _fused_partial_sum(x2d, tr, n_outer, n_inner):
    """Streaming reduction over a (rows, LANE) slab -> f32 sum of max(x,1)-min(x,0)."""
    itemsize = jnp.dtype(x2d.dtype).itemsize
    total_rows = x2d.shape[0]

    block_native = tr * LANE * itemsize
    block_f32 = tr * LANE * 4
    # Double-buffered native input + possible in-kernel f32 cast temp + slack.
    vmem_limit = min(max(2 * block_native + 2 * block_f32 + (2 << 20), 32 << 20),
                     60 << 20)

    bytes_accessed = total_rows * LANE * itemsize + n_outer * 8 * LANE * 4
    flops = 4 * total_rows * LANE

    acc = pl.pallas_call(
        _saturated_kernel,
        out_shape=jax.ShapeDtypeStruct((n_outer * 8, LANE), jnp.float32),
        grid_spec=pltpu.PrefetchScalarGridSpec(
            num_scalar_prefetch=0,
            grid=(n_outer, n_inner),
            in_specs=[
                pl.BlockSpec((tr, LANE), lambda o, i: (o * n_inner + i, 0)),
            ],
            out_specs=pl.BlockSpec((8, LANE), lambda o, i: (o, 0)),
        ),
        compiler_params=pltpu.CompilerParams(
            dimension_semantics=("parallel", "arbitrary"),
            vmem_limit_bytes=vmem_limit,
        ),
        cost_estimate=pl.CostEstimate(
            flops=flops, transcendentals=0, bytes_accessed=bytes_accessed),
    )(x2d)
    return jnp.sum(acc, dtype=jnp.float32)


@functools.partial(jax.jit, static_argnames=("reduction", "block_bytes"))
def saturated_loss(x, reduction="mean", block_bytes=TARGET_BLOCK_BYTES):
    """Pallas implementation of SaturatedLoss.forward."""
    if reduction not in ("mean", "sum"):
        raise ValueError(f"unsupported reduction: {reduction}")

    flat = x.reshape(-1)                  # native dtype; f32 cast happens in-kernel
    n = flat.shape[0]

    itemsize = jnp.dtype(x.dtype).itemsize
    packing = max(1, 4 // itemsize)       # sublane packing for sub-32-bit dtypes
    min_rows = 8 * packing                # f32: 8 rows, bf16/f16: 16, int8/fp8: 32

    rows = n // LANE
    total = jnp.float32(0.0)
    n_main = 0

    if rows >= min_rows:
        # Max rows per block so a block carries ~block_bytes of native data.
        tr_max = max(min_rows,
                     (block_bytes // (LANE * itemsize)) // min_rows * min_rows)
        # Always split across 2 outer "parallel" groups when possible (v7x megacore).
        n_outer = 2 if rows >= 2 * min_rows else 1
        n_inner = max(1, -(-rows // (n_outer * tr_max)))        # ceil div
        per = rows // (n_outer * n_inner)
        tr = (per // min_rows) * min_rows
        assert tr >= min_rows
        rows_main = n_outer * n_inner * tr
        n_main = rows_main * LANE
        main = flat if n_main == n else flat[:n_main]
        x2d = main.reshape(rows_main, LANE)
        total = _fused_partial_sum(x2d, tr, n_outer, n_inner)
    # TODO(synk): inputs with fewer than min_rows*128 elements skip the kernel
    # and are handled entirely by the plain-jnp path below.

    if n_main < n:
        # Tiny leftover (< grid_steps * (min_rows+1) * LANE elements): plain jnp
        # avoids any full-tensor pad/copy and any extra multi-MiB HBM pass.
        tail = flat[n_main:].astype(jnp.float32)
        total = total + jnp.sum(jnp.maximum(tail, 1.0) - jnp.minimum(tail, 0.0))

    if reduction == "mean":
        return total * (1.0 / n)          # Python-float reciprocal (exact for huge n)
    return total


def _reference(x, reduction="mean"):
    xf = x.astype(jnp.float32)
    if reduction == "mean":
        return jnp.mean(jnp.maximum(xf, 1.0)) - jnp.mean(jnp.minimum(xf, 0.0))
    return jnp.sum(jnp.maximum(xf, 1.0)) - jnp.sum(jnp.minimum(xf, 0.0))


if __name__ == "__main__":
    key = jax.random.PRNGKey(0)

    # NCHW input, values spanning below 0 and above 1 to exercise both clamps.
    x = jax.random.normal(key, (2, 4, 16, 16), dtype=jnp.float32) * 2.0
    out_mean = jax.block_until_ready(saturated_loss(x, reduction="mean"))
    out_sum = jax.block_until_ready(saturated_loss(x, reduction="sum"))
    ref_mean = _reference(x, "mean")
    ref_sum = _reference(x, "sum")
    assert jnp.allclose(out_mean, ref_mean, rtol=1e-5, atol=1e-5), (out_mean, ref_mean)
    assert jnp.allclose(out_sum, ref_sum, rtol=1e-5, atol=1e-2), (out_sum, ref_sum)

    # Ragged size (not a multiple of 8*128): exercises prefix + jnp tail path.
    x_ragged = jax.random.normal(key, (3, 5, 7, 11), dtype=jnp.float32) * 2.0
    out_r = jax.block_until_ready(saturated_loss(x_ragged, reduction="mean"))
    assert jnp.allclose(out_r, _reference(x_ragged, "mean"), rtol=1e-5, atol=1e-5)

    # Native bf16 streaming (cast to f32 inside the kernel).
    x_bf16 = (jax.random.normal(key, (2, 4, 16, 16), dtype=jnp.float32) * 2.0
              ).astype(jnp.bfloat16)
    out_b = jax.block_until_ready(saturated_loss(x_bf16, reduction="mean"))
    assert jnp.allclose(out_b, _reference(x_bf16, "mean"), rtol=1e-4, atol=1e-4)

    # Small block override forces a multi-step inner grid (96 "arbitrary" steps)
    # to exercise the resident-accumulator init/accumulate path.
    x_med = jax.random.normal(key, (2, 3, 256, 256), dtype=jnp.float32)
    out_m = jax.block_until_ready(
        saturated_loss(x_med, reduction="mean", block_bytes=8192))
    assert jnp.allclose(out_m, _reference(x_med, "mean"), rtol=1e-5, atol=1e-5)

    print("KERNEL_OK")
</pallas_src>

<mosaic_0001>
module attributes {stable_mosaic.version = 11 : i64} {
  func.func @_saturated_kernel(%arg0: i32, %arg1: i32, %arg2: memref<8x128xf32, #tpu.memory_space<vmem>>, %arg3: memref<8x128xf32, #tpu.memory_space<vmem>>) attributes {dimension_semantics = [#tpu.dimension_semantics<parallel>, #tpu.dimension_semantics<arbitrary>], iteration_bounds = array<i64: 2, 1>, scalar_prefetch = 0 : i64, scratch_operands = 0 : i64, tpu.core_type = #tpu.core_type<tc>, window_params = [{transform_indices = @transform_0, window_bounds = array<i64: 8, 128>}, {transform_indices = @transform_1, window_bounds = array<i64: 8, 128>}]} {
    %c0_i32 = arith.constant 0 : i32
    %0 = arith.cmpi eq, %arg1, %c0_i32 : i32
    %1 = arith.extui %0 : i1 to i32
    %c0_i32_0 = arith.constant 0 : i32
    %2 = arith.cmpi ne, %1, %c0_i32_0 : i32
    scf.if %2 {
      %cst_8 = arith.constant 0.000000e+00 : f32
      %14 = vector.broadcast %cst_8 : f32 to vector<8x128xf32>
      %c0_9 = arith.constant 0 : index
      %c0_10 = arith.constant 0 : index
      %15 = vector.load %arg3[%c0_9, %c0_10] : memref<8x128xf32, #tpu.memory_space<vmem>>, vector<8x128xf32>
      tpu.vector_store %arg3[%c0_9, %c0_10], %14 {strides = array<i32>} : memref<8x128xf32, #tpu.memory_space<vmem>>, vector<8x128xf32>,
    } else {
    }
    %c0 = arith.constant 0 : index
    %c0_1 = arith.constant 0 : index
    %3 = vector.load %arg2[%c0, %c0_1] : memref<8x128xf32, #tpu.memory_space<vmem>>, vector<8x128xf32>
    %4 = vector.shape_cast %3 : vector<8x128xf32> to vector<1x8x128xf32>
    %c0_2 = arith.constant 0 : index
    %c0_3 = arith.constant 0 : index
    %5 = vector.load %arg3[%c0_2, %c0_3] : memref<8x128xf32, #tpu.memory_space<vmem>>, vector<8x128xf32>
    %cst = arith.constant 1.000000e+00 : f32
    %6 = vector.broadcast %cst : f32 to vector<1x8x128xf32>
    %7 = arith.maximumf %4, %6 : vector<1x8x128xf32>
    %cst_4 = arith.constant 0.000000e+00 : f32
    %8 = vector.broadcast %cst_4 : f32 to vector<1x8x128xf32>
    %9 = arith.minimumf %4, %8 : vector<1x8x128xf32>
    %10 = arith.subf %7, %9 : vector<1x8x128xf32>
    %cst_5 = arith.constant dense<0.000000e+00> : vector<8x128xf32>
    %11 = vector.multi_reduction <add>, %10, %cst_5 [0] : vector<1x8x128xf32> to vector<8x128xf32>
    %12 = arith.addf %5, %11 : vector<8x128xf32>
    %c0_6 = arith.constant 0 : index
    %c0_7 = arith.constant 0 : index
    %13 = vector.load %arg3[%c0_6, %c0_7] : memref<8x128xf32, #tpu.memory_space<vmem>>, vector<8x128xf32>
    tpu.vector_store %arg3[%c0_6, %c0_7], %12 {strides = array<i32>} : memref<8x128xf32, #tpu.memory_space<vmem>>, vector<8x128xf32>,
    return
  }
  func.func @transform_0(%arg0: i32, %arg1: i32) -> (i32, i32) {
    %c1_i32 = arith.constant 1 : i32
    %0 = arith.muli %arg0, %c1_i32 : i32
    %1 = arith.addi %0, %arg1 : i32
    %c0_i32 = arith.constant 0 : i32
    %c0_i32_0 = arith.constant 0 : i32
    return %1, %c0_i32 : i32, i32
  }
  func.func @transform_1(%arg0: i32, %arg1: i32) -> (i32, i32) {
    %c0_i32 = arith.constant 0 : i32
    %c0_i32_0 = arith.constant 0 : i32
    return %arg0, %c0_i32 : i32, i32
  }
}

</mosaic_0001>

<bundles_post_ra>
// kernel: saturated_loss.1
= control target key start
LH: loop header
LB: loop body
LE: loop exit
PB: predicated region body
PF: predicated region fallthrough
CT: control target
= control target key end

     0   :  { %s273_s6 = smov 0   ;;  %s275_s7 = smov 0   ;;  %s289_s0 = inlined_call_operand.vmem [shape: f32[16,128], index: 0, kind: input, shape index: {}]   ;;  %s290_s1 = inlined_call_operand.vmem [shape: f32[16,128], index: 1, kind: output, shape index: {}]  }
   0x1   :  { %s259_s8 = smov 0  }
   0x2 LB: > { %s23_s9 = sadd.s32 1, %s257_s7  ;;  %p209_p0 = scmp.ge.s32.totalorder %s261_s8, 1  ;;  %s261_s8 = sphi %s259_s8, %s11_s8   ;;  %s257_s7 = sphi %s275_s7, %s292_s7   ;;  %s253_s6 = sphi %s273_s6, %s291_s6  }
   0x3   : > { %p25_p1 = scmp.ge.s32.totalorder %s23_s9, 2  ;;  %p102_p2 = scmp.lt.s32.totalorder %s261_s8, 3 }
   0x5   : > { %s294_s9 = smov (%p25_p1, %s23_s9), 0  ;;  %p103_p3 = pnand %p209_p0, %p102_p2 }
   0x6   : > { %p122_p4 = scmp.lt.s32.totalorder (!%p103_p3), %s253_s6, 1 }
   0x7   : > { %106 = sbr.rel (%p103_p3) target bundleno = 21 (0x15), region = 24 }
   0xc   : > { %s296_s6 = smov (!%p122_p4, %s253_s6), 1 }
   0xd   : > { %s210_s10 = sshll.u32 %s296_s6, 3 }
   0xe   : > { %s125_s13 = scalar_lea.vmem %s289_s0, %s210_s10  ;;  %s130_s16 = scalar_lea.vmem %s290_s1, %s210_s10 }
   0xf   : > { %v136_v0 = vld [vmem:[%s125_s13] sm:$0xff] }
  0x10   : > { %v138_v1 = vmax.f32 %v136_v0, 1.0  ;;  %v139_v2 = vmin.f32 %v136_v0, 0.0 }
  0x12   : > { %v140_v3 = vsub.f32 %v138_v1, %v139_v2 }
  0x14   : > { %143 = vst [vmem:[%s130_s16] sm:$0xff] %v140_v3 }
  0x15 PF: > { %s11_s8 = sadd.s32 1, %s261_s8   ;;  %s291_s6 = smov %s257_s7 }
  0x16   : > { %p8_p5 = scmp.ge.s32.totalorder %s11_s8, 4   ;;  %s292_s7 = smov %s294_s9 }
  0x18   :  { %10 = sbr.rel (!%p8_p5) target bundleno = 2 (0x2), region = 58 }

</bundles_post_ra>
